<compile_context>
chip_gen: v5e
topology: v5e:2x2
jax: 0.10.0
libtpu: 0.0.40
codegen_flags: <defaults>
</compile_context>

<pallas_src>
import jax
import jax.numpy as jnp
from jax.experimental import pallas as pl
from jax.experimental.pallas import tpu as pltpu

KEEP_PROB = 0.9
NUM_POINT = 25


def _dropblock_ske_kernel(f_ref, x_ref, o_ref):
    # f_ref: (n_blk, 1, t*v) float32 multiplier (binary * scale), broadcast over c.
    # x_ref/o_ref: (n_blk, c_blk, t*v) tiles of the input/output.
    o_ref[...] = (x_ref[...] * f_ref[...]).astype(o_ref.dtype)


def dropblock_ske(x, mask, keep_prob=KEEP_PROB):
    """x: (n, c, t, v), mask: (n, v) -> (n, c, t, v). Matches DropBlock_Ske.forward."""
    n, c, t, v = x.shape
    assert mask.shape == (n, v), "mask must reshape to (n, 1, 1, num_point)"

    # ---- grid-invariant mask math hoisted to the wrapper (n*v elements, trivial) ----
    binary = (mask < keep_prob).astype(jnp.float32)             # (n, v)
    # mask.numel() / binary.sum(); no zero-guard, identical to the PyTorch reference.
    scale = jnp.float32(n * v) / jnp.sum(binary)
    factor = binary * scale                                      # (n, v) float32

    # ---- lane-dense layout: flatten (t, v) -> t*v on the lane axis ----
    tv = t * v
    x2 = x.reshape(n, c, tv)                                     # contiguous, free
    # Lane l = ti*v + vi depends only on vi -> tile the v-pattern t times.
    factor = jnp.tile(factor, (1, t)).reshape(n, 1, tv)          # (n, 1, t*v)

    # ---- block sizing: ~2 MiB lane-dense tiles (memory-bound elementwise) ----
    target_bytes = 2 * 1024 * 1024
    row_bytes = tv * x2.dtype.itemsize
    if c * row_bytes <= target_bytes:
        # whole channel extent fits: take all of c, fuse batch elements per step
        c_blk = c
        n_blk = min(n, max(1, target_bytes // (c * row_bytes)))
    else:
        # chunk the channel axis in multiples of 8 (sublane tiling constraint)
        n_blk = 1
        c_blk = min(c, max(8, (target_bytes // row_bytes) // 8 * 8))

    grid = (pl.cdiv(n, n_blk), pl.cdiv(c, c_blk))

    out = pl.pallas_call(
        _dropblock_ske_kernel,
        out_shape=jax.ShapeDtypeStruct((n, c, tv), x.dtype),
        grid=grid,
        in_specs=[
            # per-batch multiplier row, broadcast over the c axis inside the kernel
            pl.BlockSpec((n_blk, 1, tv), lambda i, j: (i, 0, 0)),
            # lane-dense input tile
            pl.BlockSpec((n_blk, c_blk, tv), lambda i, j: (i, j, 0)),
        ],
        out_specs=pl.BlockSpec((n_blk, c_blk, tv), lambda i, j: (i, j, 0)),
        compiler_params=pltpu.CompilerParams(
            dimension_semantics=("parallel", "parallel"),
            vmem_limit_bytes=32 * 1024 * 1024,
        ),
    )(factor, x2)

    return out.reshape(n, c, t, v)


if __name__ == "__main__":
    key = jax.random.PRNGKey(0)
    kx, km = jax.random.split(key)

    n, c, t, v = 2, 4, 16, NUM_POINT
    x = jax.random.normal(kx, (n, c, t, v), dtype=jnp.float32)
    mask = jax.random.uniform(km, (n, v), dtype=jnp.float32)

    out = dropblock_ske(x, mask)
    jax.block_until_ready(out)

    # pure-JAX reference check (same semantics as the PyTorch module)
    binary = jnp.where(mask < KEEP_PROB, 1.0, 0.0)
    ref = x * binary.reshape(n, 1, 1, v) * (binary.size / jnp.sum(binary))
    assert jnp.allclose(out, ref, rtol=1e-5, atol=1e-5)

    print("KERNEL_OK")
</pallas_src>

<mosaic_0001>
module attributes {stable_mosaic.version = 11 : i64} {
  func.func @_dropblock_ske_kernel(%arg0: i32, %arg1: i32, %arg2: memref<2x1x400xf32, #tpu.memory_space<vmem>>, %arg3: memref<2x4x400xf32, #tpu.memory_space<vmem>>, %arg4: memref<2x4x400xf32, #tpu.memory_space<vmem>>) attributes {dimension_semantics = [#tpu.dimension_semantics<parallel>, #tpu.dimension_semantics<parallel>], iteration_bounds = array<i64: 1, 1>, scalar_prefetch = 0 : i64, scratch_operands = 0 : i64, tpu.core_type = #tpu.core_type<tc>, window_params = [{transform_indices = @transform_0, window_bounds = array<i64: 2, 1, 400>}, {transform_indices = @transform_1, window_bounds = array<i64: 2, 4, 400>}, {transform_indices = @transform_2, window_bounds = array<i64: 2, 4, 400>}]} {
    %c0 = arith.constant 0 : index
    %c0_0 = arith.constant 0 : index
    %c0_1 = arith.constant 0 : index
    %0 = vector.load %arg3[%c0, %c0_0, %c0_1] : memref<2x4x400xf32, #tpu.memory_space<vmem>>, vector<2x4x400xf32>
    %c0_2 = arith.constant 0 : index
    %c0_3 = arith.constant 0 : index
    %c0_4 = arith.constant 0 : index
    %1 = vector.load %arg2[%c0_2, %c0_3, %c0_4] : memref<2x1x400xf32, #tpu.memory_space<vmem>>, vector<2x1x400xf32>
    %2 = vector.broadcast %1 : vector<2x1x400xf32> to vector<2x4x400xf32>
    %3 = arith.mulf %0, %2 : vector<2x4x400xf32>
    %c0_5 = arith.constant 0 : index
    %c0_6 = arith.constant 0 : index
    %c0_7 = arith.constant 0 : index
    %4 = vector.load %arg4[%c0_5, %c0_6, %c0_7] : memref<2x4x400xf32, #tpu.memory_space<vmem>>, vector<2x4x400xf32>
    tpu.vector_store %arg4[%c0_5, %c0_6, %c0_7], %3 {strides = array<i32>} : memref<2x4x400xf32, #tpu.memory_space<vmem>>, vector<2x4x400xf32>,
    return
  }
  func.func @transform_0(%arg0: i32, %arg1: i32) -> (i32, i32, i32) {
    %c0_i32 = arith.constant 0 : i32
    %c0_i32_0 = arith.constant 0 : i32
    %c0_i32_1 = arith.constant 0 : i32
    return %arg0, %c0_i32, %c0_i32_0 : i32, i32, i32
  }
  func.func @transform_1(%arg0: i32, %arg1: i32) -> (i32, i32, i32) {
    %c0_i32 = arith.constant 0 : i32
    %c0_i32_0 = arith.constant 0 : i32
    return %arg0, %arg1, %c0_i32 : i32, i32, i32
  }
  func.func @transform_2(%arg0: i32, %arg1: i32) -> (i32, i32, i32) {
    %c0_i32 = arith.constant 0 : i32
    %c0_i32_0 = arith.constant 0 : i32
    return %arg0, %arg1, %c0_i32 : i32, i32, i32
  }
}

</mosaic_0001>

<bundles_post_ra>
// kernel: tpu_custom_call.1
= control target key start
LH: loop header
LB: loop body
LE: loop exit
PB: predicated region body
PF: predicated region fallthrough
CT: control target
= control target key end

     0   :  { %7 = vsyncpa [#allocation3], 0  ;;  %s231_s0 = inlined_call_operand.hbm [shape: f32[2,1,400], index: 0, kind: input, shape index: {}]   ;;  %s232_s1 = inlined_call_operand.hbm [shape: f32[2,4,400], index: 1, kind: input, shape index: {}]   ;;  %s233_s2 = inlined_call_operand.hbm [shape: f32[2,4,400], index: 2, kind: output, shape index: {}]  }
   0x1   :  { %8 = vsyncpa [#allocation6], 0 }
   0x2   :  { %9 = vsyncpa [#allocation4], 0  ;;  %s14_s11 = sshll.u32 %s231_s0, 4  ;;  %s188_s12 = smov [#allocation2]   ;;  %s15_s11 = int_to_ptr.hbm [resolvable:$true] %s14_s11 }
   0x3   :  { %s16_s13 = sshll.u32 %s188_s12, 4  ;;  %s27_s16 = sshll.u32 %s232_s1, 4  ;;  %s17_s13 = int_to_ptr.vmem [resolvable:$true] %s16_s13  ;;  %s28_s16 = int_to_ptr.hbm [resolvable:$true] %s27_s16 }
   0x4   :  { %s189_s17 = smov 64   ;;  %s190_s18 = smov 4  }
   0x5   :  { %22 = dma.hbm_to_vmem [thread:$0]  %s15_s11, 128, %s17_s13, [#allocation3], %s189_s17, %s189_s17, %s190_s18  }
   0x6   :  { %s191_s19 = smov [#allocation5]   ;;  %s192_s21 = smov 256  }
   0x7   :  { %s29_s20 = sshll.u32 %s191_s19, 4  ;;  %s193_s22 = smov 16   ;;  %s30_s20 = int_to_ptr.vmem [resolvable:$true] %s29_s20 }
   0x8   :  { %35 = dma.hbm_to_vmem [thread:$0]  %s28_s16, 512, %s30_s20, [#allocation6], %s192_s21, %s192_s21, %s193_s22  }
   0x9   :  { %182 = dma.done.wait [#allocation3], 128  }
   0xa   :  { %183 = vsyncadd [#allocation3], 4294967168 }
   0xb   :  { %184 = dma.done.wait [#allocation6], 512  }
   0xc   :  { %185 = vsyncadd [#allocation6], 4294966784  ;;  %v48_v0 = vld [vmem:[#allocation2] sm:$0xf]  ;;  %vm64_vm0 = vcmask 1043456   ;;  %vm78_vm1 = vcmask 130052  }
   0xd   :  { %v52_v1 = vperm.slane %v48_v0, 0  ;;  %v53_v2 = vperm.slane %v48_v0, 1  ;;  %v54_v3 = vperm.slane %v48_v0, 2  ;;  %v55_v4 = vperm.slane %v48_v0, 3  ;;  %v49_v5 = vld [vmem:[#allocation2 + $0x4] sm:$0xf]  ;;  %vm79_vm2 = vmor %vm78_vm1, %vm64_vm0 }
   0xe   :  { %v44_v6 = vld [vmem:[#allocation5] sm:$0xff]  ;;  %v45_v8 = vld [vmem:[#allocation5 + $0x8] sm:$0xff]  ;;  %v56_v10 = vperm.slane %v49_v5, 0  ;;  %v57_v11 = vperm.slane %v49_v5, 1  ;;  %v58_v12 = vperm.slane %v49_v5, 2  ;;  %v59_v13 = vperm.slane %v49_v5, 3 }
   0xf   :  { %v60_v7 = vrot.slane %v53_v2, 4  ;;  %v61_v9 = vrot.slane %v55_v4, 4  ;;  %v46_v16 = vld [vmem:[#allocation5 + $0x10] sm:$0xff]  ;;  %v47_v20 = vld [vmem:[#allocation5 + $0x18] sm:$0xff]  ;;  %s194_s0 = smov [#allocation7]   ;;  %s89_s25 = sshll.u32 %s233_s2, 4  ;;  %s90_s25 = int_to_ptr.hbm [resolvable:$true] %s89_s25 }
  0x10   :  { %v62_v17 = vrot.slane %v57_v11, 4  ;;  %v63_v21 = vrot.slane %v59_v13, 4  ;;  %s87_s1 = sshll.u32 %s194_s0, 4  ;;  %s88_s1 = int_to_ptr.vmem [resolvable:$true] %s87_s1 }
  0x11   :  { %v65_v14 = vsel %vm64_vm0, %v52_v1, %v60_v7  ;;  %v66_v15 = vsel %vm64_vm0, %v54_v3, %v61_v9 }
  0x12   :  { %v73_v18 = vmul.f32 %v65_v14, %v44_v6  ;;  %v74_v19 = vmul.f32 %v66_v15, %v45_v8  ;;  %v67_v22 = vsel %vm64_vm0, %v56_v10, %v62_v17  ;;  %v68_v24 = vsel %vm64_vm0, %v58_v12, %v63_v21 }
  0x13   :  { %v75_v23 = vmul.f32 %v67_v22, %v46_v16  ;;  %v76_v25 = vmul.f32 %v68_v24, %v47_v20 }
  0x14   :  { %77 = vst [vmem:[#allocation7] sm:$0xff] %v73_v18 }
  0x15   :  { %80 = vst.msk [vmem:[#allocation7 + $0x8] sm:$0xff] %vm79_vm2, %v74_v19 }
  0x16   :  { %81 = vst [vmem:[#allocation7 + $0x10] sm:$0xff] %v75_v23 }
  0x17   :  { %82 = vst.msk [vmem:[#allocation7 + $0x18] sm:$0xff] %vm79_vm2, %v76_v25 }
  0x18   :  { %95 = dma.vmem_to_hbm [thread:$0]  %s88_s1, 512, %s90_s25, [#allocation4], %s192_s21, %s192_s21, %s193_s22  }
  0x19   :  { %186 = dma.done.wait [#allocation4], 512  }
  0x1a   :  { %187 = vsyncadd [#allocation4], 4294966784 }
  0x1b   :  { %100 = vsyncpa [#allocation3], 1 }
  0x1c   :  { %101 = vsyncpa [#allocation6], 1 }
  0x1d   :  { %102 = vsyncpa [#allocation4], 1 }

</bundles_post_ra>
